<compile_context>
chip_gen: v7x
topology: tpu7x:2x2x1
jax: 0.10.0
libtpu: 0.0.40
codegen_flags: <defaults>
</compile_context>

<pallas_src>
import functools

import jax
import jax.numpy as jnp
from jax.experimental import pallas as pl
from jax.experimental.pallas import tpu as pltpu

LANE = 128          # TPU lane width (last-dim tiling unit)
SUBLANE_BF16 = 16   # bf16 packs 16 rows per vreg sublane group
HIDDEN_DIMS = (50, 25)


def _round_up(x, m):
    return (x + m - 1) // m * m


def _mlp_kernel(x_ref, w1_ref, b1_ref, w2_ref, b2_ref, w3_ref, b3_ref, o_ref):
    x = x_ref[...]
    # fc1 + ReLU  (bf16 x bf16 -> f32 accumulate on the MXU)
    h1 = jnp.dot(x, w1_ref[...], preferred_element_type=jnp.float32) + b1_ref[...]
    h1 = jnp.maximum(h1, 0.0).astype(x.dtype)
    # fc2 + ReLU
    h2 = jnp.dot(h1, w2_ref[...], preferred_element_type=jnp.float32) + b2_ref[...]
    h2 = jnp.maximum(h2, 0.0).astype(x.dtype)
    # fc3 (no activation)
    out = jnp.dot(h2, w3_ref[...], preferred_element_type=jnp.float32) + b3_ref[...]
    o_ref[...] = out.astype(o_ref.dtype)


@functools.partial(jax.jit, static_argnames=("block_rows", "compute_dtype"))
def mlp_forward(x, w1, b1, w2, b2, w3, b3, *, block_rows=512,
                compute_dtype=jnp.bfloat16):
    """x: [B, input_dim]; w_i: [in_i, out_i]; b_i: [1, out_i] -> [B, output_dim] f32."""
    batch, input_dim = x.shape
    out_dim = w3.shape[1]

    # ---- pad lane (last) dims to multiples of 128 (zero padding is exact) ----
    h1p = _round_up(w1.shape[1], LANE)
    h2p = _round_up(w2.shape[1], LANE)
    odp = _round_up(out_dim, LANE)

    def pad2(a, rows, cols, dtype):
        return jnp.pad(a, ((0, rows - a.shape[0]), (0, cols - a.shape[1]))).astype(dtype)

    w1p = pad2(w1, input_dim, h1p, compute_dtype)
    w2p = pad2(w2, h1p, h2p, compute_dtype)
    w3p = pad2(w3, h2p, odp, compute_dtype)
    b1p = pad2(b1, 1, h1p, jnp.float32)
    b2p = pad2(b2, 1, h2p, jnp.float32)
    b3p = pad2(b3, 1, odp, jnp.float32)

    # ---- batch tiling: multiple of 16 rows, capped at block_rows ----
    tb = min(block_rows, _round_up(batch, SUBLANE_BF16))
    bpad = _round_up(batch, tb)
    xp = jnp.pad(x, ((0, bpad - batch), (0, 0))).astype(compute_dtype)

    grid = (bpad // tb,)

    out = pl.pallas_call(
        _mlp_kernel,
        out_shape=jax.ShapeDtypeStruct((bpad, odp), jnp.float32),
        grid=grid,
        in_specs=[
            pl.BlockSpec((tb, input_dim), lambda i: (i, 0)),   # x: tiled over batch
            pl.BlockSpec((input_dim, h1p), lambda i: (0, 0)),  # weights/biases: resident
            pl.BlockSpec((1, h1p), lambda i: (0, 0)),
            pl.BlockSpec((h1p, h2p), lambda i: (0, 0)),
            pl.BlockSpec((1, h2p), lambda i: (0, 0)),
            pl.BlockSpec((h2p, odp), lambda i: (0, 0)),
            pl.BlockSpec((1, odp), lambda i: (0, 0)),
        ],
        out_specs=pl.BlockSpec((tb, odp), lambda i: (i, 0)),
        compiler_params=pltpu.CompilerParams(
            dimension_semantics=("parallel",),   # megacore-split the batch axis
        ),
    )(xp, w1p, b1p, w2p, b2p, w3p, b3p)

    # slice padded batch rows and padded output lanes back off
    return out[:batch, :out_dim]


def init_params(key, input_dim, output_dim):
    """torch.nn.Linear-style init (uniform +-1/sqrt(fan_in)).

    Weights are returned already transposed to [in, out]; biases as [1, out].
    """
    dims = [input_dim] + list(HIDDEN_DIMS) + [output_dim]
    params = []
    for i in range(3):
        fan_in, fan_out = dims[i], dims[i + 1]
        key, kw, kb = jax.random.split(key, 3)
        bound = 1.0 / jnp.sqrt(jnp.float32(fan_in))
        w = jax.random.uniform(kw, (fan_in, fan_out), jnp.float32, -bound, bound)
        b = jax.random.uniform(kb, (1, fan_out), jnp.float32, -bound, bound)
        params += [w, b]
    return params


def reference_forward_f32(x, w1, b1, w2, b2, w3, b3):
    h1 = jnp.maximum(x @ w1 + b1, 0.0)
    h2 = jnp.maximum(h1 @ w2 + b2, 0.0)
    return h2 @ w3 + b3


def reference_forward_bf16(x, w1, b1, w2, b2, w3, b3):
    c = jnp.bfloat16
    h1 = jnp.maximum(
        jnp.dot(x.astype(c), w1.astype(c), preferred_element_type=jnp.float32) + b1, 0.0
    ).astype(c)
    h2 = jnp.maximum(
        jnp.dot(h1, w2.astype(c), preferred_element_type=jnp.float32) + b2, 0.0
    ).astype(c)
    return jnp.dot(h2, w3.astype(c), preferred_element_type=jnp.float32) + b3


if __name__ == "__main__":
    batch = 8
    input_dim = 32
    output_dim = 16

    key = jax.random.PRNGKey(0)
    key, kx = jax.random.split(key)
    x = jax.random.normal(kx, (batch, input_dim), dtype=jnp.float32)

    w1, b1, w2, b2, w3, b3 = init_params(key, input_dim, output_dim)

    out = mlp_forward(x, w1, b1, w2, b2, w3, b3)
    out = jax.block_until_ready(out)
    assert out.shape == (batch, output_dim)
    assert out.dtype == jnp.float32

    # Check against a bf16-operand / f32-accumulate reference (same math path).
    ref_bf16 = reference_forward_bf16(x, w1, b1, w2, b2, w3, b3)
    assert jnp.allclose(out, ref_bf16, atol=1e-3, rtol=1e-3), "mismatch vs bf16 reference"

    # Loose sanity check against the full-f32 torch-equivalent forward.
    ref_f32 = reference_forward_f32(x, w1, b1, w2, b2, w3, b3)
    assert jnp.allclose(out, ref_f32, atol=5e-2, rtol=5e-2), "mismatch vs f32 reference"

    print("KERNEL_OK")
</pallas_src>

<mosaic_0001>
module attributes {stable_mosaic.version = 11 : i64} {
  func.func @_mlp_kernel(%arg0: i32, %arg1: memref<16x32xbf16, #tpu.memory_space<vmem>>, %arg2: memref<32x128xbf16, #tpu.memory_space<vmem>>, %arg3: memref<1x128xf32, #tpu.memory_space<vmem>>, %arg4: memref<128x128xbf16, #tpu.memory_space<vmem>>, %arg5: memref<1x128xf32, #tpu.memory_space<vmem>>, %arg6: memref<128x128xbf16, #tpu.memory_space<vmem>>, %arg7: memref<1x128xf32, #tpu.memory_space<vmem>>, %arg8: memref<16x128xf32, #tpu.memory_space<vmem>>) attributes {dimension_semantics = [#tpu.dimension_semantics<parallel>], iteration_bounds = array<i64: 1>, scalar_prefetch = 0 : i64, scratch_operands = 0 : i64, tpu.core_type = #tpu.core_type<tc>, window_params = [{transform_indices = @transform_0, window_bounds = array<i64: 16, 32>}, {pipeline_mode = #tpu.pipeline_mode<synchronous>, transform_indices = @transform_1, window_bounds = array<i64: 32, 128>}, {pipeline_mode = #tpu.pipeline_mode<synchronous>, transform_indices = @transform_2, window_bounds = array<i64: 1, 128>}, {pipeline_mode = #tpu.pipeline_mode<synchronous>, transform_indices = @transform_3, window_bounds = array<i64: 128, 128>}, {pipeline_mode = #tpu.pipeline_mode<synchronous>, transform_indices = @transform_4, window_bounds = array<i64: 1, 128>}, {pipeline_mode = #tpu.pipeline_mode<synchronous>, transform_indices = @transform_5, window_bounds = array<i64: 128, 128>}, {pipeline_mode = #tpu.pipeline_mode<synchronous>, transform_indices = @transform_6, window_bounds = array<i64: 1, 128>}, {transform_indices = @transform_7, window_bounds = array<i64: 16, 128>}]} {
    %c0 = arith.constant 0 : index
    %c0_0 = arith.constant 0 : index
    %0 = vector.load %arg1[%c0, %c0_0] : memref<16x32xbf16, #tpu.memory_space<vmem>>, vector<16x32xbf16>
    %c0_1 = arith.constant 0 : index
    %c0_2 = arith.constant 0 : index
    %1 = vector.load %arg2[%c0_1, %c0_2] : memref<32x128xbf16, #tpu.memory_space<vmem>>, vector<32x128xbf16>
    %cst = arith.constant dense<0.000000e+00> : vector<16x128xf32>
    %2 = tpu.matmul %0, %1, %cst {dimension_numbers = #tpu.dot_dimension_numbers<[1], [0], [0], [1], [0, 0, 1, 1], [], []>} : vector<16x32xbf16>, vector<32x128xbf16>, vector<16x128xf32> -> vector<16x128xf32>
    %c0_3 = arith.constant 0 : index
    %c0_4 = arith.constant 0 : index
    %3 = vector.load %arg3[%c0_3, %c0_4] : memref<1x128xf32, #tpu.memory_space<vmem>>, vector<1x128xf32>
    %4 = vector.broadcast %3 : vector<1x128xf32> to vector<16x128xf32>
    %5 = arith.addf %2, %4 : vector<16x128xf32>
    %cst_5 = arith.constant 0.000000e+00 : f32
    %6 = vector.broadcast %cst_5 : f32 to vector<16x128xf32>
    %7 = arith.maximumf %5, %6 : vector<16x128xf32>
    %8 = arith.truncf %7 : vector<16x128xf32> to vector<16x128xbf16>
    %c0_6 = arith.constant 0 : index
    %c0_7 = arith.constant 0 : index
    %9 = vector.load %arg4[%c0_6, %c0_7] : memref<128x128xbf16, #tpu.memory_space<vmem>>, vector<128x128xbf16>
    %cst_8 = arith.constant dense<0.000000e+00> : vector<16x128xf32>
    %10 = tpu.matmul %8, %9, %cst_8 {dimension_numbers = #tpu.dot_dimension_numbers<[1], [0], [0], [1], [0, 0, 1, 1], [], []>} : vector<16x128xbf16>, vector<128x128xbf16>, vector<16x128xf32> -> vector<16x128xf32>
    %c0_9 = arith.constant 0 : index
    %c0_10 = arith.constant 0 : index
    %11 = vector.load %arg5[%c0_9, %c0_10] : memref<1x128xf32, #tpu.memory_space<vmem>>, vector<1x128xf32>
    %12 = vector.broadcast %11 : vector<1x128xf32> to vector<16x128xf32>
    %13 = arith.addf %10, %12 : vector<16x128xf32>
    %cst_11 = arith.constant 0.000000e+00 : f32
    %14 = vector.broadcast %cst_11 : f32 to vector<16x128xf32>
    %15 = arith.maximumf %13, %14 : vector<16x128xf32>
    %16 = arith.truncf %15 : vector<16x128xf32> to vector<16x128xbf16>
    %c0_12 = arith.constant 0 : index
    %c0_13 = arith.constant 0 : index
    %17 = vector.load %arg6[%c0_12, %c0_13] : memref<128x128xbf16, #tpu.memory_space<vmem>>, vector<128x128xbf16>
    %cst_14 = arith.constant dense<0.000000e+00> : vector<16x128xf32>
    %18 = tpu.matmul %16, %17, %cst_14 {dimension_numbers = #tpu.dot_dimension_numbers<[1], [0], [0], [1], [0, 0, 1, 1], [], []>} : vector<16x128xbf16>, vector<128x128xbf16>, vector<16x128xf32> -> vector<16x128xf32>
    %c0_15 = arith.constant 0 : index
    %c0_16 = arith.constant 0 : index
    %19 = vector.load %arg7[%c0_15, %c0_16] : memref<1x128xf32, #tpu.memory_space<vmem>>, vector<1x128xf32>
    %20 = vector.broadcast %19 : vector<1x128xf32> to vector<16x128xf32>
    %21 = arith.addf %18, %20 : vector<16x128xf32>
    %c0_17 = arith.constant 0 : index
    %c0_18 = arith.constant 0 : index
    %22 = vector.load %arg8[%c0_17, %c0_18] : memref<16x128xf32, #tpu.memory_space<vmem>>, vector<16x128xf32>
    tpu.vector_store %arg8[%c0_17, %c0_18], %21 {strides = array<i32>} : memref<16x128xf32, #tpu.memory_space<vmem>>, vector<16x128xf32>,
    return
  }
  func.func @transform_0(%arg0: i32) -> (i32, i32) {
    %c0_i32 = arith.constant 0 : i32
    %c0_i32_0 = arith.constant 0 : i32
    return %arg0, %c0_i32 : i32, i32
  }
  func.func @transform_1(%arg0: i32) -> (i32, i32) {
    %c0_i32 = arith.constant 0 : i32
    %c0_i32_0 = arith.constant 0 : i32
    %c0_i32_1 = arith.constant 0 : i32
    return %c0_i32, %c0_i32_0 : i32, i32
  }
  func.func @transform_2(%arg0: i32) -> (i32, i32) {
    %c0_i32 = arith.constant 0 : i32
    %c0_i32_0 = arith.constant 0 : i32
    %c0_i32_1 = arith.constant 0 : i32
    return %c0_i32, %c0_i32_0 : i32, i32
  }
  func.func @transform_3(%arg0: i32) -> (i32, i32) {
    %c0_i32 = arith.constant 0 : i32
    %c0_i32_0 = arith.constant 0 : i32
    %c0_i32_1 = arith.constant 0 : i32
    return %c0_i32, %c0_i32_0 : i32, i32
  }
  func.func @transform_4(%arg0: i32) -> (i32, i32) {
    %c0_i32 = arith.constant 0 : i32
    %c0_i32_0 = arith.constant 0 : i32
    %c0_i32_1 = arith.constant 0 : i32
    return %c0_i32, %c0_i32_0 : i32, i32
  }
  func.func @transform_5(%arg0: i32) -> (i32, i32) {
    %c0_i32 = arith.constant 0 : i32
    %c0_i32_0 = arith.constant 0 : i32
    %c0_i32_1 = arith.constant 0 : i32
    return %c0_i32, %c0_i32_0 : i32, i32
  }
  func.func @transform_6(%arg0: i32) -> (i32, i32) {
    %c0_i32 = arith.constant 0 : i32
    %c0_i32_0 = arith.constant 0 : i32
    %c0_i32_1 = arith.constant 0 : i32
    return %c0_i32, %c0_i32_0 : i32, i32
  }
  func.func @transform_7(%arg0: i32) -> (i32, i32) {
    %c0_i32 = arith.constant 0 : i32
    %c0_i32_0 = arith.constant 0 : i32
    return %arg0, %c0_i32 : i32, i32
  }
}

</mosaic_0001>

<bundles_post_ra>
// kernel: mlp_forward.1
= control target key start
LH: loop header
LB: loop body
LE: loop exit
PB: predicated region body
PF: predicated region fallthrough
CT: control target
= control target key end

     0   :  { %v451_v0 = vmov 0.0   ;;  %vm452_vm0 = vmmov 0   ;;  %vm57_vm1 = vcmask 261120   ;;  %s589_s1 = inlined_call_operand.vmem [shape: bf16[32,128], index: 1, kind: input, shape index: {}]   ;;  %s590_s3 = inlined_call_operand.vmem [shape: bf16[128,128], index: 3, kind: input, shape index: {}]   ;;  %s591_s0 = inlined_call_operand.vmem [shape: bf16[16,32], index: 0, kind: input, shape index: {}]   ;;  %s592_s5 = inlined_call_operand.vmem [shape: bf16[128,128], index: 5, kind: input, shape index: {}]   ;;  %s593_s2 = inlined_call_operand.vmem [shape: f32[1,128], index: 2, kind: input, shape index: {}]   ;;  %s594_s4 = inlined_call_operand.vmem [shape: f32[1,128], index: 4, kind: input, shape index: {}]   ;;  %s595_s6 = inlined_call_operand.vmem [shape: f32[1,128], index: 6, kind: input, shape index: {}]   ;;  %s596_s7 = inlined_call_operand.vmem [shape: f32[16,128], index: 7, kind: output, shape index: {}]  }
   0x1   :  { %382 = vmatprep.subr.bf16.mxu0 %v451_v0  ;;  %v432_v1 = vld [vmem:[%s589_s1] sm:$0xff]   ;;  %386 = vmatprep.mubr.msk.bf16.mxu0 %vm452_vm0, %v451_v0  ;;  %v433_v2 = vld [vmem:[%s589_s1 + $0x8] sm:$0xff]   ;;  %v437_v6 = vld [vmem:[%s590_s3 + $0x10] sm:$0xff]  }
   0x2   :  { %390 = vmatprep.subr.bf16.mxu1 %v451_v0  ;;  %406 = vmatprep.mubr.msk.bf16.mxu1 %vm452_vm0, %v451_v0  ;;  %v435_v3 = vld [vmem:[%s590_s3] sm:$0xff]   ;;  %v436_v5 = vld [vmem:[%s590_s3 + $0x8] sm:$0xff]   ;;  %v438_v7 = vld [vmem:[%s590_s3 + $0x18] sm:$0xff]  }
   0x3   :  { %383 = vmatpush3.bf16.msra.mxu0 %v432_v1  ;;  %v434_v4 = vld [vmem:[%s591_s0] sm:$0xff]   ;;  %391 = vmatpush3.bf16.msra.mxu1 %v435_v3  ;;  %v440_v9 = vld [vmem:[%s590_s3 + $0x28] sm:$0xff]   ;;  %v441_v10 = vld [vmem:[%s590_s3 + $0x30] sm:$0xff]  }
   0x4   :  { %384 = vmatprep.subr.bf16.mxu0 %v451_v0  ;;  %392 = vmatprep.subr.bf16.mxu1 %v451_v0  ;;  %v439_v8 = vld [vmem:[%s590_s3 + $0x20] sm:$0xff]   ;;  %v442_v11 = vld [vmem:[%s590_s3 + $0x38] sm:$0xff]   ;;  %v444_v13 = vld [vmem:[%s592_s5 + $0x8] sm:$0xff]  }
   0x5   :  { %v443_v12 = vld [vmem:[%s592_s5] sm:$0xff]   ;;  %v445_v14 = vld [vmem:[%s592_s5 + $0x10] sm:$0xff]   ;;  %v446_v15 = vld [vmem:[%s592_s5 + $0x18] sm:$0xff]  }
   0x6   :  { %v447_v16 = vld [vmem:[%s592_s5 + $0x20] sm:$0xff]   ;;  %v448_v17 = vld [vmem:[%s592_s5 + $0x28] sm:$0xff]   ;;  %v449_v28 = vld [vmem:[%s592_s5 + $0x30] sm:$0xff]  }
   0x7   :  { %385 = vmatpush3.bf16.msra.mxu0 %v433_v2  ;;  %393 = vmatpush3.bf16.msra.mxu1 %v436_v5  ;;  %v338_v18 = vld [vmem:[%s593_s2] ss:$0 sm:$0xff]  ;;  %v450_v29 = vld [vmem:[%s592_s5 + $0x38] sm:$0xff]  }
   0x8   :  { %410 = vmatprep.subr.bf16.mxu0 %v451_v0  ;;  %394 = vmatprep.subr.bf16.mxu1 %v451_v0  ;;  %v343_v30 = vld [vmem:[%s594_s4] ss:$0 sm:$0xff] }
   0x9   :  { %v352_v40 = vld [vmem:[%s595_s6] ss:$0 sm:$0xff] }
   0xa   :  { %387 = vmatmul.mubr.msk.bf16.vlgmr.msra.gmra.mrb[0].mxu0 %vm57_vm1, %v434_v4 }
   0xb   :  { %426 = vmatprep.mubr.msk.bf16.mxu0 %vm452_vm0, %v451_v0  ;;  %395 = vmatpush3.bf16.msra.mxu1 %v437_v6 }
   0xc   :  { %396 = vmatprep.subr.bf16.mxu1 %v451_v0  ;;  %411 = vmatpush3.bf16.msra.mxu0 %v443_v12 }
   0xd   :  { %412 = vmatprep.subr.bf16.mxu0 %v451_v0 }
   0xf   :  { %397 = vmatpush3.bf16.msra.mxu1 %v438_v7 }
  0x10   :  { %398 = vmatprep.subr.bf16.mxu1 %v451_v0  ;;  %413 = vmatpush3.bf16.msra.mxu0 %v444_v13 }
  0x11   :  { %414 = vmatprep.subr.bf16.mxu0 %v451_v0 }
  0x13   :  { %399 = vmatpush3.bf16.msra.mxu1 %v439_v8 }
  0x14   :  { %400 = vmatprep.subr.bf16.mxu1 %v451_v0  ;;  %415 = vmatpush3.bf16.msra.mxu0 %v445_v14 }
  0x15   :  { %416 = vmatprep.subr.bf16.mxu0 %v451_v0 }
  0x17   :  { %401 = vmatpush3.bf16.msra.mxu1 %v440_v9 }
  0x18   :  { %402 = vmatprep.subr.bf16.mxu1 %v451_v0  ;;  %417 = vmatpush3.bf16.msra.mxu0 %v446_v15 }
  0x19   :  { %418 = vmatprep.subr.bf16.mxu0 %v451_v0 }
  0x1b   :  { %403 = vmatpush3.bf16.msra.mxu1 %v441_v10 }
  0x1c   :  { %404 = vmatprep.subr.bf16.mxu1 %v451_v0  ;;  %419 = vmatpush3.bf16.msra.mxu0 %v447_v16 }
  0x1d   :  { %420 = vmatprep.subr.bf16.mxu0 %v451_v0 }
  0x1f   :  { %405 = vmatpush3.bf16.msra.mxu1 %v442_v11 }
  0x20   :  { %421 = vmatpush3.bf16.msra.mxu0 %v448_v17 }
  0x21   :  { %422 = vmatprep.subr.bf16.mxu0 %v451_v0 }
  0x24   :  { %423 = vmatpush3.bf16.msra.mxu0 %v449_v28 }
  0x25   :  { %424 = vmatprep.subr.bf16.mxu0 %v451_v0 }
  0x28   :  { %425 = vmatpush3.bf16.msra.mxu0 %v450_v29 }
  0xdd   :  { %v95_v19 = vpop.f32.mrb[0].mxu0 }
  0xde   :  { %v96_v20 = vadd.f32 %v338_v18, %v95_v19  ;;  %v388_v21 = vpop.f32.mrb[1].mxu0 }
  0xdf   :  { %v98_v22 = vpop.f32.mrb[2].mxu0 }
  0xe0   :  { %v99_v23 = vadd.f32 %v338_v18, %v98_v22  ;;  %v389_v24 = vpop.f32.mrb[3].mxu0  ;;  %v102_v25 = vmax.f32 %v96_v20, 0.0 }
  0xe2   :  { %v103_v26 = vmax.f32 %v99_v23, 0.0 }
  0xe4   :  { %v104_v27 = vpack.c.bf16 %v103_v26, %v102_v25 }
  0xe6   :  { %407 = vmatmul.mubr.bf16.vlgmr.msra.gmra.mrb[0].mxu1 %v104_v27 }
 0x1b9   :  { %v210_v31 = vpop.f32.mrb[0].mxu1 }
 0x1ba   :  { %v211_v32 = vadd.f32 %v343_v30, %v210_v31  ;;  %v408_v33 = vpop.f32.mrb[1].mxu1 }
 0x1bb   :  { %v213_v34 = vpop.f32.mrb[2].mxu1 }
 0x1bc   :  { %v214_v35 = vadd.f32 %v343_v30, %v213_v34  ;;  %v409_v36 = vpop.f32.mrb[3].mxu1  ;;  %v217_v37 = vmax.f32 %v211_v32, 0.0 }
 0x1be   :  { %v218_v38 = vmax.f32 %v214_v35, 0.0 }
 0x1c0   :  { %v219_v39 = vpack.c.bf16 %v218_v38, %v217_v37 }
 0x1c2   :  { %427 = vmatmul.mubr.bf16.vlgmr.msra.gmra.mrb[4].mxu0 %v219_v39 }
 0x295   :  { %v325_v41 = vpop.f32.mrb[4].mxu0 }
 0x296   :  { %v326_v42 = vadd.f32 %v352_v40, %v325_v41  ;;  %v428_v43 = vpop.f32.mrb[5].mxu0 }
 0x297   :  { %v328_v44 = vpop.f32.mrb[6].mxu0 }
 0x298   :  { %332 = vst [vmem:[%s596_s7] sm:$0xff] %v326_v42  ;;  %v329_v45 = vadd.f32 %v352_v40, %v328_v44  ;;  %v429_v46 = vpop.f32.mrb[7].mxu0 }
 0x29a   :  { %333 = vst [vmem:[%s596_s7 + $0x8] sm:$0xff] %v329_v45 }

</bundles_post_ra>
